<compile_context>
chip_gen: v7x
topology: tpu7x:2x2x1
jax: 0.10.0
libtpu: 0.0.40
codegen_flags: <defaults>
</compile_context>

<pallas_src>
import math
from functools import partial

import numpy as np
import jax
import jax.numpy as jnp
from jax.experimental import pallas as pl
from jax.experimental.pallas import tpu as pltpu


def _cdiv(a, m):
    return (a + m - 1) // m


def _round_up(a, m):
    return _cdiv(a, m) * m


# ---------------------------------------------------------------------------
# Pallas kernel: one batch tile (batch on lanes, statevector on sublanes).
# ---------------------------------------------------------------------------
def _quantum_kernel(xin_ref,     # (n, TB)    raw inputs, transposed
                    bits_ref,    # (2D, n)    bit (n-1-j) of state s (tiled x2)
                    w_ref,       # (2D, 2D)   folded entangler unitary * phase
                    z2_ref,      # (n, 2D)    Z eigenvalue signs (tiled x2)
                    out_ref):    # (n, TB)
    n = xin_ref.shape[0]

    # Half-angle trig in-kernel (keeps x HBM traffic at n floats per sample;
    # note: this lowers to VALU polynomials, counted as VALU work).
    half = 0.5 * xin_ref[...]
    cs = jnp.cos(half)                      # (n, TB)
    sn = jnp.sin(half)                      # (n, TB)

    # Closed-form product state after RX(x_j) on |0...0>:
    #   |psi_s| = prod_j (cos_j if bit_j(s)==0 else sin_j)
    # The (-i)^popcount(s) phase is already folded into w_ref (W @ diag(phase)),
    # so the kernel only needs the magnitude vector, stacked twice -> (2D, TB).
    bmask = bits_ref[...] != 0.0                                 # (2D, n) bool
    mag = jnp.where(bmask[:, 0:1], sn[0:1, :], cs[0:1, :])       # (2D, TB)
    for j in range(1, n):
        mag = mag * jnp.where(bmask[:, j:j + 1], sn[j:j + 1, :], cs[j:j + 1, :])

    # BasicEntanglerLayers (+ embedding phase) folded into one real matmul:
    #   [Re psi'; Im psi'] = W_folded @ mag
    st = jnp.dot(w_ref[...], mag, preferred_element_type=jnp.float32)

    # <Z_i> = sum_s (Re^2 + Im^2)_s * (+/-1)  -- one (n, 2D) matmul on st^2.
    sq = st * st
    out_ref[...] = jnp.dot(z2_ref[...], sq, preferred_element_type=jnp.float32)


# ---------------------------------------------------------------------------
# Wrapper: constant / unitary setup (batch-independent glue) + pallas_call.
# Whole thing runs under one jit so transposes/pads/U-fold fuse with the call.
# ---------------------------------------------------------------------------
@partial(jax.jit, static_argnames=("tile_b",))
def quantum_layer(x, weights, *, tile_b=4096):
    shape = x.shape
    n = int(shape[-1])
    L = int(weights.shape[0])
    D = 1 << n
    D2 = 2 * D

    xf = jnp.asarray(x, jnp.float32).reshape(-1, n)
    B = xf.shape[0]

    # ---- batch tile selection (lane axis, multiple of 128) -----------------
    Bp0 = _round_up(B, 128)
    # Cap tb by a VMEM budget for live intermediates (~6 (2D,tb) f32 buffers
    # + double-buffered x/out tiles), safe on v7x's 64 MiB physical VMEM.
    bytes_per_col = (6 * D2 + 4 * n) * 4
    budget = 24 * 1024 * 1024
    tb_cap = max(128, (budget // bytes_per_col) // 128 * 128)
    tb_target = max(128, min(int(tile_b), tb_cap))
    num_tiles = max(1, _cdiv(Bp0, tb_target))
    if Bp0 >= 256 and num_tiles == 1:
        num_tiles = 2               # keep both v7x TensorCores busy
    tb = _round_up(_cdiv(Bp0, num_tiles), 128)
    Bp = tb * num_tiles

    xt = xf.T                                                    # (n, B)
    if Bp != B:
        xt = jnp.pad(xt, ((0, 0), (0, Bp - B)))

    # ---- batch- and weight-independent constants (numpy, trace-time) -------
    idx = np.arange(D)
    bits = np.stack([(idx >> (n - 1 - j)) & 1 for j in range(n)],
                    axis=1).astype(np.float32)                   # (D, n)
    bits2 = np.concatenate([bits, bits], axis=0)                 # (2D, n)

    pop = np.array([bin(s).count("1") for s in range(D)]) % 4
    ph_re = np.array([1.0, 0.0, -1.0, 0.0], np.float32)[pop]     # Re (-i)^k
    ph_im = np.array([0.0, -1.0, 0.0, 1.0], np.float32)[pop]     # Im (-i)^k
    phase2 = np.concatenate([ph_re, ph_im]).astype(np.float32)   # (2D,)

    zsT = np.stack([1.0 - 2.0 * ((idx >> (n - 1 - i)) & 1) for i in range(n)],
                   axis=0).astype(np.float32)                    # (n, D)
    z2 = np.concatenate([zsT, zsT], axis=1)                      # (n, 2D)

    # CNOT-ring permutation matrix P: (P psi)[g(k)] = psi[k].
    if n == 2:
        pairs = [(0, 1)]
    elif n > 2:
        pairs = [(j, (j + 1) % n) for j in range(n)]
    else:
        pairs = []
    g = np.arange(D)
    for (cq, tq) in pairs:
        pc = n - 1 - cq
        mt = 1 << (n - 1 - tq)
        g = g ^ (((g >> pc) & 1) * mt)
    P = np.zeros((D, D), np.complex64)
    P[g, np.arange(D)] = 1.0

    # ---- fold all entangler layers into one complex D x D unitary (tiny) ---
    w32 = jnp.asarray(weights, jnp.float32)
    cw = jnp.cos(0.5 * w32).astype(jnp.complex64)
    sw = jnp.sin(0.5 * w32).astype(jnp.complex64)
    Pj = jnp.asarray(P)
    U = jnp.eye(D, dtype=jnp.complex64)
    for l in range(L):
        layer = jnp.ones((1, 1), jnp.complex64)
        for j in range(n):
            rx = jnp.stack([jnp.stack([cw[l, j], -1j * sw[l, j]]),
                            jnp.stack([-1j * sw[l, j], cw[l, j]])])
            layer = jnp.kron(layer, rx)                          # qubit j -> bit n-1-j
        U = Pj @ layer @ U
    Ure = jnp.real(U).astype(jnp.float32)
    Uim = jnp.imag(U).astype(jnp.float32)
    W = jnp.concatenate(
        [jnp.concatenate([Ure, -Uim], axis=1),
         jnp.concatenate([Uim, Ure], axis=1)], axis=0)           # (2D, 2D)
    # Fold the (-i)^popcount embedding phase: W_folded = W @ diag(phase2).
    W = W * jnp.asarray(phase2)[None, :]

    bits2_j = jnp.asarray(bits2)
    z2_j = jnp.asarray(z2)

    # Explicit VMEM budget (raises v5e's 16 MiB scoped default; < 64 MiB v7x).
    est = (4 * n * tb + D2 * n + D2 * D2 + n * D2 + 8 * D2 * tb) * 4
    vmem_limit = int(min(60 * 1024 * 1024, max(32 * 1024 * 1024, 2 * est)))

    const_buf = pl.Buffered(1)   # constants: single-buffered, index never changes
    grid = (Bp // tb,)
    out = pl.pallas_call(
        _quantum_kernel,
        out_shape=jax.ShapeDtypeStruct((n, Bp), jnp.float32),
        grid_spec=pltpu.PrefetchScalarGridSpec(
            num_scalar_prefetch=0,
            grid=grid,
            in_specs=[
                pl.BlockSpec((n, tb), lambda i: (0, i)),          # x (transposed)
                pl.BlockSpec((D2, n), lambda i: (0, 0),
                             pipeline_mode=const_buf),            # bits
                pl.BlockSpec((D2, D2), lambda i: (0, 0),
                             pipeline_mode=const_buf),            # W (phase folded)
                pl.BlockSpec((n, D2), lambda i: (0, 0),
                             pipeline_mode=const_buf),            # z-signs
            ],
            out_specs=pl.BlockSpec((n, tb), lambda i: (0, i)),
        ),
        compiler_params=pltpu.CompilerParams(
            dimension_semantics=("parallel",),
            vmem_limit_bytes=vmem_limit),
    )(xt, bits2_j, W, z2_j)

    return out[:, :B].T.reshape(shape)


# ---------------------------------------------------------------------------
# Independent dense-unitary reference (numpy) for verification.
# ---------------------------------------------------------------------------
def _reference(x, weights):
    shape = x.shape
    n = shape[-1]
    D = 1 << n
    xf = np.asarray(x, np.float64).reshape(-1, n)
    w = np.asarray(weights, np.float64)
    L = w.shape[0]

    I2 = np.eye(2)

    def rx(theta):
        c, s = np.cos(theta / 2), np.sin(theta / 2)
        return np.array([[c, -1j * s], [-1j * s, c]])

    def full_op(op, q):
        mats = [I2] * n
        mats[q] = op
        out = mats[0]
        for m in mats[1:]:
            out = np.kron(out, m)
        return out

    def cnot_full(cq, tq):
        U = np.zeros((D, D), complex)
        for k in range(D):
            bit = (k >> (n - 1 - cq)) & 1
            U[k ^ (bit * (1 << (n - 1 - tq))), k] = 1.0
        return U

    outs = []
    for row in xf:
        psi = np.zeros(D, complex)
        psi[0] = 1.0
        for j in range(n):
            psi = full_op(rx(row[j]), j) @ psi
        for l in range(L):
            for j in range(n):
                psi = full_op(rx(w[l, j]), j) @ psi
            if n == 2:
                psi = cnot_full(0, 1) @ psi
            elif n > 2:
                for j in range(n):
                    psi = cnot_full(j, (j + 1) % n) @ psi
        probs = np.abs(psi) ** 2
        outs.append([np.sum(probs * (1 - 2 * ((np.arange(D) >> (n - 1 - i)) & 1)))
                     for i in range(n)])
    return np.asarray(outs, np.float32).reshape(shape)


if __name__ == "__main__":
    num_qubits = 4
    num_qlayers = 2

    key = jax.random.PRNGKey(0)
    kx, kw = jax.random.split(key)

    # x: (batch=2, seq=8, features=num_qubits=4)
    x = jax.random.uniform(kx, (2, 8, num_qubits),
                           minval=-math.pi, maxval=math.pi, dtype=jnp.float32)
    # kaiming_normal_ on (num_qlayers, num_qubits): std = sqrt(2 / fan_in)
    weights = jax.random.normal(kw, (num_qlayers, num_qubits),
                                dtype=jnp.float32) * math.sqrt(2.0 / num_qubits)

    y = quantum_layer(x, weights)
    y = jax.block_until_ready(y)

    y_ref = _reference(np.asarray(x), np.asarray(weights))
    assert y.shape == x.shape and y.dtype == jnp.float32
    np.testing.assert_allclose(np.asarray(y), y_ref, rtol=1e-4, atol=1e-4)

    print("KERNEL_OK")
</pallas_src>

<mosaic_0001>
module attributes {stable_mosaic.version = 11 : i64} {
  func.func @_quantum_kernel(%arg0: i32, %arg1: memref<4x128xf32, #tpu.memory_space<vmem>>, %arg2: memref<32x4xf32, #tpu.memory_space<vmem>>, %arg3: memref<32x32xf32, #tpu.memory_space<vmem>>, %arg4: memref<4x32xf32, #tpu.memory_space<vmem>>, %arg5: memref<4x128xf32, #tpu.memory_space<vmem>>) attributes {dimension_semantics = [#tpu.dimension_semantics<parallel>], iteration_bounds = array<i64: 1>, scalar_prefetch = 0 : i64, scratch_operands = 0 : i64, tpu.core_type = #tpu.core_type<tc>, window_params = [{transform_indices = @transform_0, window_bounds = array<i64: 4, 128>}, {pipeline_mode = #tpu.pipeline_mode<synchronous>, transform_indices = @transform_1, window_bounds = array<i64: 32, 4>}, {pipeline_mode = #tpu.pipeline_mode<synchronous>, transform_indices = @transform_2, window_bounds = array<i64: 32, 32>}, {pipeline_mode = #tpu.pipeline_mode<synchronous>, transform_indices = @transform_3, window_bounds = array<i64: 4, 32>}, {transform_indices = @transform_4, window_bounds = array<i64: 4, 128>}]} {
    %c0 = arith.constant 0 : index
    %c0_0 = arith.constant 0 : index
    %0 = vector.load %arg1[%c0, %c0_0] : memref<4x128xf32, #tpu.memory_space<vmem>>, vector<4x128xf32>
    %cst = arith.constant 5.000000e-01 : f32
    %1 = vector.broadcast %cst : f32 to vector<4x128xf32>
    %2 = arith.mulf %1, %0 : vector<4x128xf32>
    %3 = math.cos %2 : vector<4x128xf32>
    %4 = math.sin %2 : vector<4x128xf32>
    %c0_1 = arith.constant 0 : index
    %c0_2 = arith.constant 0 : index
    %5 = vector.load %arg2[%c0_1, %c0_2] : memref<32x4xf32, #tpu.memory_space<vmem>>, vector<32x4xf32>
    %cst_3 = arith.constant 0.000000e+00 : f32
    %6 = vector.broadcast %cst_3 : f32 to vector<32x4xf32>
    %7 = arith.cmpf one, %5, %6 : vector<32x4xf32>
    %8 = vector.extract_strided_slice %7 {offsets = [0, 0], sizes = [32, 1], strides = [1, 1]} : vector<32x4xi1> to vector<32x1xi1>
    %9 = vector.extract_strided_slice %4 {offsets = [0, 0], sizes = [1, 128], strides = [1, 1]} : vector<4x128xf32> to vector<1x128xf32>
    %10 = vector.extract_strided_slice %3 {offsets = [0, 0], sizes = [1, 128], strides = [1, 1]} : vector<4x128xf32> to vector<1x128xf32>
    %11 = vector.shape_cast %8 : vector<32x1xi1> to vector<32x1xi1>
    %12 = vector.broadcast %11 : vector<32x1xi1> to vector<32x128xi1>
    %13 = vector.shape_cast %9 : vector<1x128xf32> to vector<1x128xf32>
    %14 = vector.broadcast %13 : vector<1x128xf32> to vector<32x128xf32>
    %15 = vector.shape_cast %10 : vector<1x128xf32> to vector<1x128xf32>
    %16 = vector.broadcast %15 : vector<1x128xf32> to vector<32x128xf32>
    %17 = arith.select %12, %14, %16 : vector<32x128xi1>, vector<32x128xf32>
    %18 = vector.extract_strided_slice %7 {offsets = [0, 1], sizes = [32, 1], strides = [1, 1]} : vector<32x4xi1> to vector<32x1xi1>
    %19 = vector.extract_strided_slice %4 {offsets = [1, 0], sizes = [1, 128], strides = [1, 1]} : vector<4x128xf32> to vector<1x128xf32>
    %20 = vector.extract_strided_slice %3 {offsets = [1, 0], sizes = [1, 128], strides = [1, 1]} : vector<4x128xf32> to vector<1x128xf32>
    %21 = vector.shape_cast %18 : vector<32x1xi1> to vector<32x1xi1>
    %22 = vector.broadcast %21 : vector<32x1xi1> to vector<32x128xi1>
    %23 = vector.shape_cast %19 : vector<1x128xf32> to vector<1x128xf32>
    %24 = vector.broadcast %23 : vector<1x128xf32> to vector<32x128xf32>
    %25 = vector.shape_cast %20 : vector<1x128xf32> to vector<1x128xf32>
    %26 = vector.broadcast %25 : vector<1x128xf32> to vector<32x128xf32>
    %27 = arith.select %22, %24, %26 : vector<32x128xi1>, vector<32x128xf32>
    %28 = arith.mulf %17, %27 : vector<32x128xf32>
    %29 = vector.extract_strided_slice %7 {offsets = [0, 2], sizes = [32, 1], strides = [1, 1]} : vector<32x4xi1> to vector<32x1xi1>
    %30 = vector.extract_strided_slice %4 {offsets = [2, 0], sizes = [1, 128], strides = [1, 1]} : vector<4x128xf32> to vector<1x128xf32>
    %31 = vector.extract_strided_slice %3 {offsets = [2, 0], sizes = [1, 128], strides = [1, 1]} : vector<4x128xf32> to vector<1x128xf32>
    %32 = vector.shape_cast %29 : vector<32x1xi1> to vector<32x1xi1>
    %33 = vector.broadcast %32 : vector<32x1xi1> to vector<32x128xi1>
    %34 = vector.shape_cast %30 : vector<1x128xf32> to vector<1x128xf32>
    %35 = vector.broadcast %34 : vector<1x128xf32> to vector<32x128xf32>
    %36 = vector.shape_cast %31 : vector<1x128xf32> to vector<1x128xf32>
    %37 = vector.broadcast %36 : vector<1x128xf32> to vector<32x128xf32>
    %38 = arith.select %33, %35, %37 : vector<32x128xi1>, vector<32x128xf32>
    %39 = arith.mulf %28, %38 : vector<32x128xf32>
    %40 = vector.extract_strided_slice %7 {offsets = [0, 3], sizes = [32, 1], strides = [1, 1]} : vector<32x4xi1> to vector<32x1xi1>
    %41 = vector.extract_strided_slice %4 {offsets = [3, 0], sizes = [1, 128], strides = [1, 1]} : vector<4x128xf32> to vector<1x128xf32>
    %42 = vector.extract_strided_slice %3 {offsets = [3, 0], sizes = [1, 128], strides = [1, 1]} : vector<4x128xf32> to vector<1x128xf32>
    %43 = vector.shape_cast %40 : vector<32x1xi1> to vector<32x1xi1>
    %44 = vector.broadcast %43 : vector<32x1xi1> to vector<32x128xi1>
    %45 = vector.shape_cast %41 : vector<1x128xf32> to vector<1x128xf32>
    %46 = vector.broadcast %45 : vector<1x128xf32> to vector<32x128xf32>
    %47 = vector.shape_cast %42 : vector<1x128xf32> to vector<1x128xf32>
    %48 = vector.broadcast %47 : vector<1x128xf32> to vector<32x128xf32>
    %49 = arith.select %44, %46, %48 : vector<32x128xi1>, vector<32x128xf32>
    %50 = arith.mulf %39, %49 : vector<32x128xf32>
    %c0_4 = arith.constant 0 : index
    %c0_5 = arith.constant 0 : index
    %51 = vector.load %arg3[%c0_4, %c0_5] : memref<32x32xf32, #tpu.memory_space<vmem>>, vector<32x32xf32>
    %cst_6 = arith.constant dense<0.000000e+00> : vector<32x128xf32>
    %52 = tpu.matmul %51, %50, %cst_6 {dimension_numbers = #tpu.dot_dimension_numbers<[1], [0], [0], [1], [0, 0, 1, 1], [], []>} : vector<32x32xf32>, vector<32x128xf32>, vector<32x128xf32> -> vector<32x128xf32>
    %53 = arith.mulf %52, %52 : vector<32x128xf32>
    %c0_7 = arith.constant 0 : index
    %c0_8 = arith.constant 0 : index
    %54 = vector.load %arg4[%c0_7, %c0_8] : memref<4x32xf32, #tpu.memory_space<vmem>>, vector<4x32xf32>
    %cst_9 = arith.constant dense<0.000000e+00> : vector<4x128xf32>
    %55 = tpu.matmul %54, %53, %cst_9 {dimension_numbers = #tpu.dot_dimension_numbers<[1], [0], [0], [1], [0, 0, 1, 1], [], []>} : vector<4x32xf32>, vector<32x128xf32>, vector<4x128xf32> -> vector<4x128xf32>
    %c0_10 = arith.constant 0 : index
    %c0_11 = arith.constant 0 : index
    %56 = vector.load %arg5[%c0_10, %c0_11] : memref<4x128xf32, #tpu.memory_space<vmem>>, vector<4x128xf32>
    tpu.vector_store %arg5[%c0_10, %c0_11], %55 {strides = array<i32>} : memref<4x128xf32, #tpu.memory_space<vmem>>, vector<4x128xf32>,
    return
  }
  func.func @transform_0(%arg0: i32) -> (i32, i32) {
    %c0_i32 = arith.constant 0 : i32
    %c0_i32_0 = arith.constant 0 : i32
    return %c0_i32, %arg0 : i32, i32
  }
  func.func @transform_1(%arg0: i32) -> (i32, i32) {
    %c0_i32 = arith.constant 0 : i32
    %c0_i32_0 = arith.constant 0 : i32
    %c0_i32_1 = arith.constant 0 : i32
    return %c0_i32, %c0_i32_0 : i32, i32
  }
  func.func @transform_2(%arg0: i32) -> (i32, i32) {
    %c0_i32 = arith.constant 0 : i32
    %c0_i32_0 = arith.constant 0 : i32
    %c0_i32_1 = arith.constant 0 : i32
    return %c0_i32, %c0_i32_0 : i32, i32
  }
  func.func @transform_3(%arg0: i32) -> (i32, i32) {
    %c0_i32 = arith.constant 0 : i32
    %c0_i32_0 = arith.constant 0 : i32
    %c0_i32_1 = arith.constant 0 : i32
    return %c0_i32, %c0_i32_0 : i32, i32
  }
  func.func @transform_4(%arg0: i32) -> (i32, i32) {
    %c0_i32 = arith.constant 0 : i32
    %c0_i32_0 = arith.constant 0 : i32
    return %c0_i32, %arg0 : i32, i32
  }
}

</mosaic_0001>

<bundles_post_ra>
// kernel: quantum_layer.1
= control target key start
LH: loop header
LB: loop body
LE: loop exit
PB: predicated region body
PF: predicated region fallthrough
CT: control target
= control target key end

     0   :  { %v644_v0 = vmov 1   ;;  %v645_v1 = vmov 0   ;;  %v646_v14 = vmov 2   ;;  %v647_v18 = vmov 3   ;;  %s781_s1 = inlined_call_operand.vmem [shape: f32[32,4], index: 1, kind: input, shape index: {}]   ;;  %s782_s0 = inlined_call_operand.vmem [shape: f32[4,128], index: 0, kind: input, shape index: {}]   ;;  %s783_s2 = inlined_call_operand.vmem [shape: f32[32,32], index: 2, kind: input, shape index: {}]   ;;  %s784_s3 = inlined_call_operand.vmem [shape: f32[4,32], index: 3, kind: input, shape index: {}]   ;;  %s785_s4 = inlined_call_operand.vmem [shape: f32[4,128], index: 4, kind: output, shape index: {}]  }
   0x1   :  { %630 = vset.pattern.permute.xlu1 %v644_v0  ;;  %629 = vset.pattern.permute.xlu0 %v645_v1  ;;  %v226_v2 = vld [vmem:[%s781_s1] sm:$0xff]  ;;  %v227_v3 = vld [vmem:[%s781_s1 + $0x8] sm:$0xff]  ;;  %v229_v5 = vld [vmem:[%s781_s1 + $0x18] sm:$0xff]  ;;  %v648_v24 = vmov 683565275   ;;  %vm366_vm10 = vcmask 261120  }
   0x2   :  { %vm230_vm0 = vcmp.ne.f32.partialorder %v226_v2, 0.0  ;;  %vm231_vm1 = vcmp.ne.f32.partialorder %v227_v3, 0.0  ;;  %v17_v6 = vld [vmem:[%s782_s0] sm:$0xf]  ;;  %vm233_vm2 = vcmp.ne.f32.partialorder %v229_v5, 0.0  ;;  %v228_v11 = vld [vmem:[%s781_s1 + $0x10] sm:$0xff] }
   0x3   :  { %v234_v4 = vsel %vm230_vm0, 1, %v645_v1  ;;  %v694_v7 = vsel %vm231_vm1, 1, %v645_v1  ;;  %v696_v8 = vmul.f32 0.5, %v17_v6  ;;  %v701_v10 = vsel %vm233_vm2, 1, %v645_v1  ;;  %v362_v6 = vld [vmem:[%s783_s2] sm:$0xff] }
   0x4   :  { %267 = vperm.xlu1 %630, %v234_v4   ;;  %239 = vperm.xlu0 %629, %v234_v4   ;;  %vm232_vm3 = vcmp.ne.f32.partialorder %v228_v11, 0.0  ;;  %v649_v26 = vmov 2475754826   ;;  %v650_v28 = vmov 2131351028  }
   0x5   :  { %v22_v9 = vand.u32 2139095040, %v696_v8  ;;  %v19_v16 = vand.u32 2147483647, %v696_v8  ;;  %v710_v17 = vsel %vm232_vm3, 1, %v645_v1  ;;  %v651_v30 = vmov 2102212464   ;;  %581 = vmatprep.mubr.msk.f32.mxu0 %vm366_vm10, %v362_v6 }
   0x6   :  { %v652_v32 = vmov 920167782   ;;  %v653_v39 = vmov 1326507024   ;;  %vm21_vm12 = vcmp.lt.s32.totalorder %v696_v8, 0 }
   0x7   :  { %v23_v12 = vshrl.u32 %v22_v9, 23  ;;  %v26_v21 = vand.u32 8388607, %v19_v16  ;;  %vm20_vm13 = vcmp.le.f32.partialorder %v19_v16, 0.7853982 }
   0x8   :  { %270 = vperm.xlu1 %630, %v694_v7   ;;  %242 = vperm.xlu0 %629, %v694_v7  }
   0x9   :  { %v547_v13 = vadd.s32 4294967169, %v23_v12  ;;  %v27_v37 = vor.u32 8388608, %v26_v21 }
   0xb   :  { %v29_v15 = vadd.s32 1, %v547_v13  ;;  %v67_v52 = vshll.u32 %v27_v37, 8 }
   0xc   :  { %631 = vset.pattern.permute.xlu1 %v646_v14  ;;  %248 = vperm.xlu0 %629, %v701_v10  }
   0xd   :  { %302 = vperm.xlu1 %631, %v694_v7   ;;  %vm30_vm4 = vcmp.gt.s32.totalorder %v29_v15, 0 }
   0xe   :  { %v31_v19 = vsel %vm30_vm4, %v29_v15, 0  ;;  %vm111_vm4 = vweird.f32 %v696_v8 }
   0xf   :  { %v33_v20 = vand.u32 31, %v31_v19  ;;  %v32_v22 = vshrl.u32 %v31_v19, 5 }
  0x10   :  { %634 = vset.pattern.permute.xlu0 %v647_v18 }
  0x11   :  { %632 = vset.pattern.permute.xlu1 %v645_v1  ;;  %331 = vperm.xlu0 %634, %v234_v4   ;;  %v34_v23 = vsub.s32 32, %v33_v20  ;;  %v36_v25 = vshll.u32 %v648_v24, %v33_v20  ;;  %v39_v27 = vshll.u32 %v649_v26, %v33_v20  ;;  %v42_v29 = vshll.u32 %v650_v28, %v33_v20 }
  0x12   :  { %245 = vperm.xlu1 %632, %v710_v17   ;;  %v45_v31 = vshll.u32 %v651_v30, %v33_v20  ;;  %v48_v33 = vshll.u32 %v652_v32, %v33_v20  ;;  %vm51_vm5 = vcmp.lt.s32.totalorder %v32_v22, 1  ;;  %vm54_vm6 = vcmp.lt.s32.totalorder %v32_v22, 4 }
  0x13   :  { %v37_v34 = vshrl.u32 %v649_v26, %v34_v23  ;;  %v40_v35 = vshrl.u32 %v650_v28, %v34_v23  ;;  %v43_v36 = vshrl.u32 %v651_v30, %v34_v23  ;;  %v46_v38 = vshrl.u32 %v652_v32, %v34_v23 }
  0x14   :  { %v49_v40 = vshrl.u32 %v653_v39, %v34_v23  ;;  %vm53_vm7 = vcmp.lt.s32.totalorder %v32_v22, 3  ;;  %vm52_vm8 = vcmp.lt.s32.totalorder %v32_v22, 2  ;;  %v35_v57 = vshrl.u32 %v648_v24, %v34_v23 }
  0x15   :  { %635 = vset.pattern.permute.xlu0 %v646_v14  ;;  %v38_v41 = vor.u32 %v37_v34, %v36_v25  ;;  %v41_v42 = vor.u32 %v40_v35, %v39_v27  ;;  %v44_v43 = vor.u32 %v43_v36, %v42_v29  ;;  %v47_v44 = vor.u32 %v46_v38, %v45_v31 }
  0x16   :  { %633 = vset.pattern.permute.xlu1 %v644_v0  ;;  %299 = vperm.xlu0 %635, %v234_v4   ;;  %v50_v45 = vor.u32 %v49_v40, %v48_v33 }
  0x17   :  { %273 = vperm.xlu1 %633, %v710_v17   ;;  %v59_v46 = vsel %vm51_vm5, %v38_v41, %v41_v42  ;;  %v60_v47 = vsel %vm54_vm6, %v47_v44, 920167782  ;;  %v63_v48 = vsel %vm51_vm5, %v41_v42, %v44_v43  ;;  %v56_v60 = vsel %vm54_vm6, %v44_v43, 2102212464 }
  0x18   :  { %v64_v49 = vsel %vm54_vm6, %v50_v45, 1326507024  ;;  %v61_v50 = vsel %vm53_vm7, %v44_v43, %v60_v47  ;;  %v55_v61 = vsel %vm51_vm5, %v35_v57, %v38_v41  ;;  %v57_v62 = vsel %vm53_vm7, %v41_v42, %v56_v60 }
  0x19   :  { %v65_v51 = vsel %vm53_vm7, %v47_v44, %v64_v49  ;;  %v62_v53 = vsel %vm52_vm8, %v59_v46, %v61_v50  ;;  %v58_v63 = vsel %vm52_vm8, %v55_v61, %v57_v62  ;;  %v254_v43 = vlaneseq }
  0x1a   :  { %308 = vperm.xlu0 %635, %v701_v10   ;;  %v66_v54 = vsel %vm52_vm8, %v63_v48, %v65_v51  ;;  %v730_v55 = vmul.u32.u64.low %v67_v52, %v62_v53  ;;  %v731_v56 = vmul.u32.u64.high %v67_v52, %v62_v53, %v730_v55  ;;  %v74_v1 = vmul.u32 %v67_v52, %v58_v63 }
  0x1b   :  { %276 = vperm.xlu1 %633, %v701_v10   ;;  %v734_v58 = vmul.u32.u64.low %v67_v52, %v66_v54  ;;  %v735_v59 = vmul.u32.u64.high %v67_v52, %v66_v54, %v734_v58  ;;  %v255_v51 = vshrl.u32 %v254_v43, 7 }
  0x1c   :  { %v77_v0 = vadd.s32 1, %v731_v56 }
  0x1d   :  { %vm76_vm9 = vc.u32 %v735_v59, %v730_v55  ;;  %v316_v60 = vsub.s32 2, %v255_v51 }
  0x1e   :  { %639 = vset.pattern.permute.xlu0 %v647_v18  ;;  %v78_v2 = vsel %vm76_vm9, %v77_v0, %v731_v56  ;;  %v256_v56 = vsub.s32 0, %v255_v51 }
  0x1f   :  { %636 = vset.pattern.permute.xlu1 %v647_v18  ;;  %v79_v3 = vadd.s32 %v78_v2, %v74_v1  ;;  %v348_v2 = vsub.s32 3, %v255_v51 }
  0x20   :  { %334 = vperm.xlu1 %636, %v694_v7  }
  0x21   :  { %v80_v4 = vadd.s32 536870912, %v79_v3 }
  0x23   :  { %v81_v5 = vshrl.u32 %v80_v4, 30 }
  0x24   :  { %637 = vset.pattern.permute.xlu1 %v646_v14 }
  0x25   :  { %305 = vperm.xlu1 %637, %v710_v17   ;;  %v82_v7 = vshll.u32 %v81_v5, 30  ;;  %v105_v30 = vsub.s32 4, %v81_v5 }
  0x27   :  { %v83_v9 = vsub.s32 %v79_v3, %v82_v7  ;;  %v106_v32 = vsel %vm21_vm12, %v105_v30, %v81_v5 }
  0x28   :  { %v108_v33 = vsel %vm20_vm13, 0, %v106_v32 }
  0x29   :  { %638 = vset.pattern.permute.xlu1 %v647_v18  ;;  %v85_v11 = vsub.s32 0, %v83_v9  ;;  %v215_v34 = vadd.s32 3, %v108_v33  ;;  %v112_v39 = vand.u32 3, %v108_v33 }
  0x2a   :  { %337 = vperm.xlu1 %638, %v710_v17  }
  0x2b   :  { %v548_v12 = vmin.u32 %v85_v11, %v83_v9  ;;  %v216_v40 = vand.u32 3, %v215_v34  ;;  %vm114_vm14 = vcmp.eq.s32.totalorder %v112_v39, 0  ;;  %vm117_vm15 = vcmp.eq.s32.totalorder %v112_v39, 2 }
  0x2c   :  { %vm113_vm2 = vcmp.lt.s32.totalorder %v112_v39, 2 }
  0x2d   :  { %v87_v13 = vclz %v548_v12  ;;  %vm218_vm0 = vcmp.eq.s32.totalorder %v216_v40, 0  ;;  %vm221_vm1 = vcmp.eq.s32.totalorder %v216_v40, 2  ;;  %vm217_vm3 = vcmp.lt.s32.totalorder %v216_v40, 2 }
  0x2e   :  { %340 = vperm.xlu1 %638, %v701_v10   ;;  %v75_v10 = vadd.s32 %v730_v55, %v735_v59  ;;  %v284_v55 = vsub.s32 1, %v255_v51 }
  0x2f   :  { %v549_v14 = vadd.s32 4294967294, %v87_v13 }
  0x31   :  { %vm550_vm11 = vcmp.lt.s32.totalorder %v549_v14, 0 }
  0x32   :  { %v90_v15 = vsel %vm550_vm11, 0, %v549_v14 }
  0x33   :  { %v95_v17 = vsub.s32 4294967266, %v90_v15  ;;  %v91_v18 = vsub.s32 32, %v90_v15  ;;  %v92_v20 = vshll.u32 %v83_v9, %v90_v15 }
  0x35   :  { %v96_v19 = vadd.s32 127, %v95_v17  ;;  %v93_v21 = vshrl.u32 %v75_v10, %v91_v18 }
  0x37   :  { %v97_v22 = vshll.u32 %v96_v19, 23  ;;  %v94_v23 = vor.u32 %v93_v21, %v92_v20 }
  0x39   :  { %v98_v24 = vor.u32 4788187, %v97_v22  ;;  %v101_v26 = vcvt.s32.f32 %v94_v23 }
  0x3b   :  { %v99_v25 = vand.u32 2147483647, %v98_v24 }
  0x3d   :  { %v102_v27 = vmul.f32 %v101_v26, %v99_v25 }
  0x3f   :  { %v103_v28 = vxor.u32 2147483648, %v102_v27 }
  0x41   :  { %v104_v29 = vsel %vm21_vm12, %v103_v28, %v102_v27 }
  0x42   :  { %v107_v31 = vsel %vm20_vm13, %v696_v8, %v104_v29 }
  0x43   :  { %640 = vcosq.f32 %v107_v31 }
  0x44   :  { %642 = vsinq.f32 %v107_v31 }
  0x4d   :  { %v641_v37 = vpop.eup %640 }
  0x4e   :  { %v643_v38 = vpop.eup %642  ;;  %v118_v16 = vxor.u32 2147483648, %v641_v37 }
  0x4f   :  { %v115_v44 = vxor.u32 2147483648, %v643_v38 }
  0x50   :  { %v119_v47 = vsel %vm117_vm15, %v118_v16, %v643_v38  ;;  %v223_v49 = vsel %vm221_vm1, %v118_v16, %v643_v38  ;;  %v363_v16 = vld [vmem:[%s783_s2 + $0x8] sm:$0xff] }
  0x51   :  { %v116_v46 = vsel %vm114_vm14, %v641_v37, %v115_v44  ;;  %v220_v48 = vsel %vm218_vm0, %v641_v37, %v115_v44 }
  0x52   :  { %v120_v52 = vsel %vm113_vm2, %v116_v46, %v119_v47  ;;  %v224_v53 = vsel %vm217_vm3, %v220_v48, %v223_v49  ;;  %v365_v46 = vld [vmem:[%s783_s2 + $0x18] sm:$0xff]  ;;  %v654_v47 = vmov 0.0|0.0   ;;  %v656_v48 = vmov 0.0  }
  0x53   :  { %v121_v58 = vsel %vm111_vm4, nan, %v120_v52  ;;  %v225_v59 = vsel %vm111_vm4, nan, %v224_v53  ;;  %606 = vmatprep.subr.bf16.mxu1 %v654_v47 }
  0x54   :  { %v285_v61 = vrot.slane %v225_v59, %v284_v55  ;;  %v289_v62 = vrot.slane %v121_v58, %v284_v55  ;;  %v257_v63 = vrot.slane %v225_v59, %v256_v56  ;;  %v261_v0 = vrot.slane %v121_v58, %v256_v56 }
  0x55   :  { %v317_v5 = vrot.slane %v225_v59, %v316_v60  ;;  %v321_v6 = vrot.slane %v121_v58, %v316_v60  ;;  %v349_v7 = vrot.slane %v225_v59, %v348_v2  ;;  %v353_v13 = vrot.slane %v121_v58, %v348_v2  ;;  %v468_v59 = vld [vmem:[%s784_s3] sm:$0xf] }
  0x83   :  { %v268_v35 = vpop.permute.xlu1 %267  ;;  %v240_v36 = vpop.permute.xlu0 %239 }
  0x84   :  { %vm278_vm5 = vcmp.eq.s32.totalorder %v268_v35, 1  ;;  %vm250_vm6 = vcmp.eq.s32.totalorder %v240_v36, 1 }
  0x85   :  { %v290_v8 = vsel %vm278_vm5, %v285_v61, %v289_v62  ;;  %v262_v4 = vsel %vm250_vm6, %v257_v63, %v261_v0  ;;  %vm655_vm6 = vmmov 0  }
  0x86   :  { %v294_v15 = vmul.f32 %v290_v8, %v262_v4  ;;  %595 = vmatprep.mubr.msk.f32.mxu1 %vm655_vm6, %v656_v48 }
  0x87   :  { %v271_v41 = vpop.permute.xlu1 %270  ;;  %v243_v42 = vpop.permute.xlu0 %242 }
  0x88   :  { %vm279_vm7 = vcmp.eq.s32.totalorder %v271_v41, 1  ;;  %vm251_vm8 = vcmp.eq.s32.totalorder %v243_v42, 1 }
  0x89   :  { %v291_v11 = vsel %vm279_vm7, %v285_v61, %v289_v62  ;;  %v263_v12 = vsel %vm251_vm8, %v257_v63, %v261_v0 }
  0x8a   :  { %v295_v10 = vmul.f32 %v291_v11, %v263_v12 }
  0x8b   :  { %v758_v45 = vpop.permute.xlu0 %248 }
  0x8c   :  { %v303_v50 = vpop.permute.xlu1 %302  ;;  %vm253_vm15 = vcmp.eq.s32.totalorder %v758_v45, 1  ;;  %v364_v45 = vld [vmem:[%s783_s2 + $0x10] sm:$0xff] }
  0x8d   :  { %vm311_vm11 = vcmp.eq.s32.totalorder %v303_v50, 1  ;;  %v265_v29 = vsel %vm253_vm15, %v257_v63, %v261_v0 }
  0x8e   :  { %v323_v17 = vsel %vm311_vm11, %v317_v5, %v321_v6 }
  0x8f   :  { %v327_v21 = vmul.f32 %v323_v17, %v295_v10 }
  0x90   :  { %v332_v54 = vpop.permute.xlu0 %331 }
  0x91   :  { %v246_v57 = vpop.permute.xlu1 %245  ;;  %vm342_vm12 = vcmp.eq.s32.totalorder %v332_v54, 1 }
  0x92   :  { %v354_v19 = vsel %vm342_vm12, %v349_v7, %v353_v13  ;;  %vm252_vm1 = vcmp.eq.s32.totalorder %v246_v57, 1 }
  0x93   :  { %v264_v33 = vsel %vm252_vm1, %v257_v63, %v261_v0 }
  0x95   :  { %v300_v1 = vpop.permute.xlu0 %299 }
  0x96   :  { %v274_v3 = vpop.permute.xlu1 %273  ;;  %vm310_vm9 = vcmp.eq.s32.totalorder %v300_v1, 1 }
  0x97   :  { %v322_v14 = vsel %vm310_vm9, %v317_v5, %v321_v6  ;;  %vm280_vm0 = vcmp.eq.s32.totalorder %v274_v3, 1 }
  0x98   :  { %v326_v18 = vmul.f32 %v322_v14, %v294_v15  ;;  %v292_v30 = vsel %vm280_vm0, %v285_v61, %v289_v62 }
  0x99   :  { %v309_v27 = vpop.permute.xlu0 %308  ;;  %v296_v36 = vmul.f32 %v292_v30, %v264_v33 }
  0x9a   :  { %v277_v9 = vpop.permute.xlu1 %276  ;;  %v358_v23 = vmul.f32 %v354_v19, %v326_v18  ;;  %vm313_vm2 = vcmp.eq.s32.totalorder %v309_v27, 1 }
  0x9b   :  { %vm281_vm14 = vcmp.eq.s32.totalorder %v277_v9, 1  ;;  %v325_v34 = vsel %vm313_vm2, %v317_v5, %v321_v6 }
  0x9c   :  { %v293_v28 = vsel %vm281_vm14, %v285_v61, %v289_v62 }
  0x9d   :  { %v297_v32 = vmul.f32 %v293_v28, %v265_v29 }
  0x9f   :  { %v335_v20 = vpop.permute.xlu1 %334  ;;  %v329_v39 = vmul.f32 %v325_v34, %v297_v32 }
  0xa0   :  { %vm343_vm13 = vcmp.eq.s32.totalorder %v335_v20, 1 }
  0xa1   :  { %v355_v22 = vsel %vm343_vm13, %v349_v7, %v353_v13 }
  0xa2   :  { %v359_v24 = vmul.f32 %v355_v22, %v327_v21 }
  0xa4   :  { %v306_v25 = vpop.permute.xlu1 %305  ;;  %v598_v26 = vpack.c.bf16 %v359_v24, %v358_v23 }
  0xa5   :  { %vm312_vm3 = vcmp.eq.s32.totalorder %v306_v25, 1 }
  0xa6   :  { %599 = vmatprep.subr.bf16.mxu0 %v598_v26  ;;  %v324_v35 = vsel %vm312_vm3, %v317_v5, %v321_v6 }
  0xa7   :  { %601 = vmatpush3.bf16.msra.mxu0 %v598_v26  ;;  %v328_v40 = vmul.f32 %v324_v35, %v296_v36 }
  0xa9   :  { %v338_v31 = vpop.permute.xlu1 %337 }
  0xaa   :  { %vm344_vm4 = vcmp.eq.s32.totalorder %v338_v31, 1 }
  0xab   :  { %v356_v37 = vsel %vm344_vm4, %v349_v7, %v353_v13 }
  0xac   :  { %v360_v42 = vmul.f32 %v356_v37, %v328_v40 }
  0xad   :  { %v341_v38 = vpop.permute.xlu1 %340 }
  0xae   :  { %vm345_vm5 = vcmp.eq.s32.totalorder %v341_v38, 1 }
  0xaf   :  { %v357_v41 = vsel %vm345_vm5, %v349_v7, %v353_v13 }
  0xb0   :  { %v361_v43 = vmul.f32 %v357_v41, %v329_v39 }
  0xb2   :  { %v602_v44 = vpack.c.bf16 %v361_v43, %v360_v42 }
  0xb4   :  { %603 = vmatprep.subr.bf16.mxu0 %v602_v44 }
  0xb5   :  { %605 = vmatpush3.bf16.msra.mxu0 %v602_v44 }
  0xb8   :  { %582 = vmatmul.mubr.msk.f32.vlgmr.msra.gmra.mrb[0].mxu0 %vm366_vm10, %v363_v16 }
  0xb9   :  { %584 = vmatprep.mubr.msk.f32.mxu0 %vm366_vm10, %v364_v45 }
  0xbc   :  { %585 = vmatmul.mubr.msk.f32.gmra.mrb[2].mxu0 %vm366_vm10, %v365_v46 }
 0x18b   :  { %v583_v49 = vpop.f32.mrb[0].mxu0 }
 0x18c   :  { %v465_v50 = vmul.f32 %v583_v49, %v583_v49  ;;  %v445_v51 = vpop.f32.mrb[1].mxu0 }
 0x18d   :  { %v464_v52 = vmul.f32 %v445_v51, %v445_v51 }
 0x18f   :  { %v586_v53 = vpop.f32.mrb[2].mxu0  ;;  %v607_v54 = vpack.c.bf16 %v465_v50, %v464_v52 }
 0x190   :  { %v467_v55 = vmul.f32 %v586_v53, %v586_v53  ;;  %v455_v56 = vpop.f32.mrb[3].mxu0 }
 0x191   :  { %v466_v57 = vmul.f32 %v455_v56, %v455_v56  ;;  %608 = vmatpush3.bf16.msra.mxu1 %v607_v54 }
 0x192   :  { %609 = vmatprep.subr.bf16.mxu1 %v654_v47 }
 0x193   :  { %v610_v58 = vpack.c.bf16 %v467_v55, %v466_v57 }
 0x195   :  { %611 = vmatpush3.bf16.msra.mxu1 %v610_v58 }
 0x198   :  { %596 = vmatmul.mubr.msk.f32.vlgmr.msra.gmra.mrb[0].mxu1 %vm366_vm10, %v468_v59 }
 0x26b   :  { %v538_v60 = vpop.f32.mrb[0].mxu1 }
 0x26c   :  { %542 = vst [vmem:[%s785_s4] sm:$0xf] %v538_v60  ;;  %v597_v61 = vpop.f32.mrb[1].mxu1 }

</bundles_post_ra>
